<compile_context>
chip_gen: v5e
topology: v5e:2x2
jax: 0.10.0
libtpu: 0.0.40
codegen_flags: <defaults>
</compile_context>

<pallas_src>
import functools

import jax
import jax.numpy as jnp
from jax import lax
from jax.experimental import pallas as pl
from jax.experimental.pallas import tpu as pltpu


def _round_up(x: int, m: int) -> int:
    return ((x + m - 1) // m) * m


def _tpu_defaults():
    """Per-generation (input_tile_budget_bytes, vmem_limit_bytes, multi_tc)."""
    try:
        kind = jax.devices()[0].device_kind.lower()
    except Exception:
        kind = ""
    if ("v5" in kind) or ("v6" in kind) or ("trillium" in kind):
        # 128 MiB physical VMEM, single TensorCore per chip.
        return 12 << 20, 64 << 20, False
    if "7" in kind:
        # v7x: 64 MiB physical VMEM, 2 TensorCores per chip.
        return 14 << 20, 48 << 20, True
    # Unknown / older parts: stay conservative, keep compiler default limit.
    return 4 << 20, None, False


def _choose_tiles(B, S, H, itemsize, budget, multi_tc):
    """Pick (TB, TS): batch tile and sentence tile for a ~budget-byte input buffer."""
    # Sublane packing: 8 rows/vreg at 32-bit, 16 at 16-bit, 32 at 8-bit.
    sub = 8 * max(1, 4 // max(1, itemsize))
    row_bytes = S * H * itemsize  # one batch row, full sequence

    TB = B if B <= sub else sub
    if TB * row_bytes <= budget:
        # Whole sequence per grid step; grow TB (multiple of sub) to fill budget.
        TS = S
        if B > sub:
            TB = min((budget // row_bytes) // sub * sub, _round_up(B, sub))
            TB = max(TB, sub)
            if TB >= B:
                TB = B  # full-batch block (always layout-legal)
                if multi_tc:
                    # v7x only: keep >= 2 batch grid steps so both TensorCores
                    # get work.  On 1-TC chips this would only shrink the DMA.
                    half = _round_up((B + 1) // 2, sub)
                    if half < B:
                        TB = half
    else:
        # One row-block is too big: block the sequence axis too.
        TS = max((budget // max(1, TB * H * itemsize)) // sub * sub, sub)
        if TS >= S:
            TS = S
        else:
            # Prefer a TS that divides S (no ragged tail -> no masking at all),
            # as long as it is not much smaller than the budget-derived TS.
            best = 0
            for cand in range(TS, sub - 1, -sub):
                if S % cand == 0:
                    best = cand
                    break
            if best >= max(sub, TS // 2):
                TS = best
    return TB, TS


def _mean_kernel_fast(x_ref, o_ref, *, total_s):
    # ns == 1: whole sequence in one tile -> no scratch, no init/finalize.
    o_ref[...] = (jnp.sum(x_ref[...], axis=1, dtype=jnp.float32)
                  * (1.0 / total_s)).astype(o_ref.dtype)


def _mean_kernel_blocked(x_ref, o_ref, acc_ref, *, total_s, ts, needs_mask):
    # x_ref: (TB, TS, H) tile, o_ref: (TB, H) tile, acc_ref: (TB, H) f32 scratch.
    k = pl.program_id(1)
    ns = pl.num_programs(1)

    @pl.when(k == 0)
    def _init():
        acc_ref[...] = jnp.zeros_like(acc_ref)

    if needs_mask:
        # Hot path: all full blocks accumulate unmasked (no iota/where on the
        # bandwidth-critical path).  Only the ragged last block is masked.
        @pl.when(k < ns - 1)
        def _accum_full():
            acc_ref[...] += jnp.sum(x_ref[...], axis=1, dtype=jnp.float32)

        @pl.when(k == ns - 1)
        def _accum_tail():
            x = x_ref[...]
            row = lax.broadcasted_iota(jnp.int32, x.shape, 1) + k * ts
            x = jnp.where(row < total_s, x, jnp.zeros_like(x))
            acc_ref[...] += jnp.sum(x, axis=1, dtype=jnp.float32)
    else:
        acc_ref[...] += jnp.sum(x_ref[...], axis=1, dtype=jnp.float32)

    @pl.when(k == ns - 1)
    def _finalize():
        o_ref[...] = (acc_ref[...] * (1.0 / total_s)).astype(o_ref.dtype)


def _mean_kernel_split(x_ref, part_ref, acc_ref, *, total_s, ts, ns, ns_half,
                       needs_mask):
    # Dual-TensorCore split over the sequence axis (nb == 1 case on v7x).
    # x_ref: (TB, TS, H); part_ref: (1, TB, H) f32 partial sum; acc: (TB, H) f32.
    p = pl.program_id(0)
    k = pl.program_id(1)
    blk = p * ns_half + k  # logical S-block index; may be a duplicate for p=1

    @pl.when(k == 0)
    def _init():
        acc_ref[...] = jnp.zeros_like(acc_ref)

    last_full = (ns - 1) if needs_mask else ns

    @pl.when(blk < last_full)
    def _accum_full():
        acc_ref[...] += jnp.sum(x_ref[...], axis=1, dtype=jnp.float32)

    if needs_mask:
        @pl.when(blk == ns - 1)
        def _accum_tail():
            x = x_ref[...]
            row = lax.broadcasted_iota(jnp.int32, x.shape, 1) + blk * ts
            x = jnp.where(row < total_s, x, jnp.zeros_like(x))
            acc_ref[...] += jnp.sum(x, axis=1, dtype=jnp.float32)

    @pl.when(k == ns_half - 1)
    def _finalize():
        part_ref[0] = acc_ref[...]


def doc_extractor_mean(sents_vec: jax.Array, *,
                       vmem_budget_bytes: int | None = None,
                       vmem_limit_bytes: int | None = None,
                       force_multi_tc: bool | None = None) -> jax.Array:
    """Pallas equivalent of Doc_extractor(d_ex_type='mean').forward."""
    B, S, H = sents_vec.shape
    itemsize = jnp.dtype(sents_vec.dtype).itemsize

    d_budget, d_limit, d_multi = _tpu_defaults()
    budget = d_budget if vmem_budget_bytes is None else vmem_budget_bytes
    vlimit = d_limit if vmem_limit_bytes is None else vmem_limit_bytes
    multi_tc = d_multi if force_multi_tc is None else force_multi_tc

    TB, TS = _choose_tiles(B, S, H, itemsize, budget, multi_tc)
    nb = pl.cdiv(B, TB)
    ns = pl.cdiv(S, TS)
    needs_mask = (S % TS) != 0

    cost = pl.CostEstimate(flops=B * S * H, transcendentals=0,
                           bytes_accessed=B * S * H * itemsize + B * H * itemsize)

    if ns == 1:
        # Whole sequence per grid step: single sum + scale + store.
        return pl.pallas_call(
            functools.partial(_mean_kernel_fast, total_s=S),
            out_shape=jax.ShapeDtypeStruct((B, H), sents_vec.dtype),
            grid=(nb,),
            in_specs=[pl.BlockSpec((TB, S, H), lambda b: (b, 0, 0))],
            out_specs=pl.BlockSpec((TB, H), lambda b: (b, 0)),
            compiler_params=pltpu.CompilerParams(
                dimension_semantics=("parallel",),
                vmem_limit_bytes=vlimit),
            cost_estimate=cost,
        )(sents_vec)

    if multi_tc and nb == 1 and ns >= 2:
        # Small batch + long document on a 2-TC chip: split the sequence
        # between the cores via a leading "parallel" axis; combine partials
        # (and apply 1/S) in a tiny trailing jnp op.
        ns_half = pl.cdiv(ns, 2)
        kernel = functools.partial(_mean_kernel_split, total_s=S, ts=TS,
                                   ns=ns, ns_half=ns_half, needs_mask=needs_mask)
        partials = pl.pallas_call(
            kernel,
            out_shape=jax.ShapeDtypeStruct((2, B, H), jnp.float32),
            grid=(2, ns_half),
            in_specs=[pl.BlockSpec(
                (TB, TS, H),
                lambda p, k: (0, jnp.minimum(p * ns_half + k, ns - 1), 0))],
            out_specs=pl.BlockSpec((1, B, H), lambda p, k: (p, 0, 0)),
            scratch_shapes=[pltpu.VMEM((TB, H), jnp.float32)],
            compiler_params=pltpu.CompilerParams(
                dimension_semantics=("parallel", "arbitrary"),
                vmem_limit_bytes=vlimit),
            cost_estimate=cost,
        )(sents_vec)
        return ((partials[0] + partials[1]) * (1.0 / S)).astype(sents_vec.dtype)

    # General blocked reduction over S with a resident f32 accumulator.
    kernel = functools.partial(_mean_kernel_blocked, total_s=S, ts=TS,
                               needs_mask=needs_mask)
    return pl.pallas_call(
        kernel,
        out_shape=jax.ShapeDtypeStruct((B, H), sents_vec.dtype),
        grid=(nb, ns),
        in_specs=[pl.BlockSpec((TB, TS, H), lambda b, k: (b, k, 0))],
        out_specs=pl.BlockSpec((TB, H), lambda b, k: (b, 0)),
        scratch_shapes=[pltpu.VMEM((TB, H), jnp.float32)],
        compiler_params=pltpu.CompilerParams(
            dimension_semantics=("parallel", "arbitrary"),
            vmem_limit_bytes=vlimit),
        cost_estimate=cost,
    )(sents_vec)


# No learnable parameters in Doc_extractor.__init__ (only a string flag), so
# nothing to initialize. Only the 'mean' branch produces a defined output in
# the reference module, so that is what we implement.

if __name__ == "__main__":
    key = jax.random.PRNGKey(0)
    k0, k1, k2, k3, k4, k5 = jax.random.split(key, 6)

    def check(x, out, atol=1e-5, rtol=1e-5):
        ref = jnp.mean(x.astype(jnp.float32), axis=1).astype(x.dtype)
        assert out.shape == ref.shape and out.dtype == x.dtype
        assert jnp.allclose(out.astype(jnp.float32), ref.astype(jnp.float32),
                            atol=atol, rtol=rtol)

    # 1) Small case matching the PyTorch module layout (batch, n_sents, hidden):
    #    single-step fast path.
    x = jax.random.normal(k0, (2, 8, 32), dtype=jnp.float32)
    check(x, jax.block_until_ready(doc_extractor_mean(x)))

    # 2) Larger batch, whole-sequence tiles (fast path; batch-blocked on v7x).
    x = jax.random.normal(k1, (24, 8, 128), dtype=jnp.float32)
    check(x, jax.block_until_ready(doc_extractor_mean(x)))

    # 3) Blocked-S reduction with a ragged tail (mask only on the last k step;
    #    tiny artificial budget forces the blocked path).
    x = jax.random.normal(k2, (20, 20, 128), dtype=jnp.float32)
    check(x, jax.block_until_ready(
        doc_extractor_mean(x, vmem_budget_bytes=32 * 1024)))

    # 4) Dual-TensorCore split path (forced), TS divides S -> no masking.
    x = jax.random.normal(k3, (4, 40, 128), dtype=jnp.float32)
    check(x, jax.block_until_ready(
        doc_extractor_mean(x, vmem_budget_bytes=32 * 1024, force_multi_tc=True)))

    # 5) Dual-TensorCore split path with a ragged (masked) tail block.
    x = jax.random.normal(k4, (4, 36, 128), dtype=jnp.float32)
    check(x, jax.block_until_ready(
        doc_extractor_mean(x, vmem_budget_bytes=32 * 1024, force_multi_tc=True)))

    # 6) bf16 input: sublane packing rounds tiles to multiples of 16.
    x = jax.random.normal(k5, (24, 16, 128), dtype=jnp.bfloat16)
    check(x, jax.block_until_ready(doc_extractor_mean(x)), atol=2e-2, rtol=2e-2)

    print("KERNEL_OK")
</pallas_src>

<mosaic_0001>
module attributes {stable_mosaic.version = 11 : i64} {
  func.func @_mean_kernel_fast(%arg0: i32, %arg1: memref<2x8x32xf32, #tpu.memory_space<vmem>>, %arg2: memref<2x32xf32, #tpu.memory_space<vmem>>) attributes {dimension_semantics = [#tpu.dimension_semantics<parallel>], iteration_bounds = array<i64: 1>, scalar_prefetch = 0 : i64, scratch_operands = 0 : i64, tpu.core_type = #tpu.core_type<tc>, window_params = [{transform_indices = @transform_0, window_bounds = array<i64: 2, 8, 32>}, {transform_indices = @transform_1, window_bounds = array<i64: 2, 32>}]} {
    %c0 = arith.constant 0 : index
    %c0_0 = arith.constant 0 : index
    %c0_1 = arith.constant 0 : index
    %0 = vector.load %arg1[%c0, %c0_0, %c0_1] : memref<2x8x32xf32, #tpu.memory_space<vmem>>, vector<2x8x32xf32>
    %cst = arith.constant dense<0.000000e+00> : vector<2x32xf32>
    %1 = vector.multi_reduction <add>, %0, %cst [1] : vector<2x8x32xf32> to vector<2x32xf32>
    %cst_2 = arith.constant 1.250000e-01 : f32
    %2 = vector.broadcast %cst_2 : f32 to vector<2x32xf32>
    %3 = arith.mulf %1, %2 : vector<2x32xf32>
    %c0_3 = arith.constant 0 : index
    %c0_4 = arith.constant 0 : index
    %4 = vector.load %arg2[%c0_3, %c0_4] : memref<2x32xf32, #tpu.memory_space<vmem>>, vector<2x32xf32>
    tpu.vector_store %arg2[%c0_3, %c0_4], %3 {strides = array<i32>} : memref<2x32xf32, #tpu.memory_space<vmem>>, vector<2x32xf32>,
    return
  }
  func.func @transform_0(%arg0: i32) -> (i32, i32, i32) {
    %c0_i32 = arith.constant 0 : i32
    %c0_i32_0 = arith.constant 0 : i32
    %c0_i32_1 = arith.constant 0 : i32
    return %arg0, %c0_i32, %c0_i32_0 : i32, i32, i32
  }
  func.func @transform_1(%arg0: i32) -> (i32, i32) {
    %c0_i32 = arith.constant 0 : i32
    %c0_i32_0 = arith.constant 0 : i32
    return %arg0, %c0_i32 : i32, i32
  }
}

</mosaic_0001>

<bundles_post_ra>
// kernel: tpu_custom_call.1
= control target key start
LH: loop header
LB: loop body
LE: loop exit
PB: predicated region body
PF: predicated region fallthrough
CT: control target
= control target key end

     0   :  { %6 = vsyncpa [#allocation3], 0  ;;  %s144_s0 = inlined_call_operand.hbm [shape: f32[2,8,32], index: 0, kind: input, shape index: {}]   ;;  %s145_s1 = inlined_call_operand.hbm [shape: f32[2,32], index: 1, kind: output, shape index: {}]  }
   0x1   :  { %7 = vsyncpa [#allocation4], 0  ;;  %s12_s8 = sshll.u32 %s144_s0, 4  ;;  %s124_s9 = smov [#allocation2]   ;;  %s13_s8 = int_to_ptr.hbm [resolvable:$true] %s12_s8 }
   0x2   :  { %s14_s10 = sshll.u32 %s124_s9, 4  ;;  %s125_s11 = smov 128   ;;  %s15_s10 = int_to_ptr.vmem [resolvable:$true] %s14_s10 }
   0x3   :  { %s126_s12 = smov 8  }
   0x4   :  { %20 = dma.hbm_to_vmem [thread:$0]  %s13_s8, 256, %s15_s10, [#allocation3], %s125_s11, %s125_s11, %s126_s12  }
   0x5   :  { %120 = dma.done.wait [#allocation3], 256  }
   0x6   :  { %121 = vsyncadd [#allocation3], 4294967040  ;;  %vm27_vm0 = vcmask 261120   ;;  %v25_v0 = vld [vmem:[#allocation2] sm:$0xff]  ;;  %v26_v1 = vld [vmem:[#allocation2 + $0x8] sm:$0xff]  ;;  %s127_s0 = smov [#allocation5]  }
   0x7   :  { %v28_v2 = vsel %vm27_vm0, %v25_v0, 0.0  ;;  %v35_v3 = vsel %vm27_vm0, %v26_v1, 0.0  ;;  %s56_s13 = sshll.u32 %s127_s0, 4  ;;  %s58_s16 = sshll.u32 %s145_s1, 4  ;;  %vm46_vm1 = vcmask 1041409   ;;  %vm49_vm2 = vcmask 254976   ;;  %s57_s13 = int_to_ptr.vmem [resolvable:$true] %s56_s13  ;;  %s59_s16 = int_to_ptr.hbm [resolvable:$true] %s58_s16 }
   0x8   :  { %v29_v4 = vrot.slane %v28_v2, 4  ;;  %v36_v5 = vrot.slane %v35_v3, 4 }
   0xa   :  { %v30_v6 = vadd.f32 %v29_v4, %v28_v2  ;;  %v37_v7 = vadd.f32 %v36_v5, %v35_v3 }
   0xc   :  { %v31_v8 = vrot.slane %v30_v6, 2  ;;  %v38_v9 = vrot.slane %v37_v7, 2 }
   0xe   :  { %v32_v10 = vadd.f32 %v31_v8, %v30_v6  ;;  %v39_v11 = vadd.f32 %v38_v9, %v37_v7 }
  0x10   :  { %v33_v12 = vrot.slane %v32_v10, 1  ;;  %v40_v13 = vrot.slane %v39_v11, 1 }
  0x12   :  { %v34_v14 = vadd.f32 %v33_v12, %v32_v10  ;;  %v41_v15 = vadd.f32 %v40_v13, %v39_v11 }
  0x14   :  { %v42_v16 = vmul.f32 0.125, %v34_v14  ;;  %v43_v17 = vmul.f32 0.125, %v41_v15 }
  0x16   :  { %v47_v18 = vsel %vm46_vm1, %v43_v17, %v42_v16 }
  0x17   :  { %50 = vst.msk [vmem:[#allocation5] sm:$0x3] %vm49_vm2, %v47_v18 }
  0x18   :  { %61 = dma.vmem_to_hbm [thread:$0]  %s57_s13, 32, %s59_s16, [#allocation4]  }
  0x19   :  { %122 = dma.done.wait [#allocation4], 32  }
  0x1a   :  { %123 = vsyncadd [#allocation4], 4294967264 }
  0x1b   :  { %66 = vsyncpa [#allocation3], 1 }
  0x1c   :  { %67 = vsyncpa [#allocation4], 1 }

</bundles_post_ra>
